<compile_context>
chip_gen: v7x
topology: tpu7x:2x2x1
jax: 0.10.0
libtpu: 0.0.40
codegen_flags: <defaults>
</compile_context>

<pallas_src>
import functools

import jax
import jax.numpy as jnp
from jax.experimental import pallas as pl
from jax.experimental.pallas import tpu as pltpu


def _round_up(x, m):
    return ((x + m - 1) // m) * m


def vae_kernel(a_ref, w_ref, b_ref, o_ref, *, dim_image):
    """All tensors are padded to a common lane width P (multiple of 128).

    a_ref : [TM, P]      f32   activation slab:  x | eps | 0
    w_ref : [7, P, P]    bf16  zero-padded weight slots
    b_ref : [7, 1, P]    f32   zero-padded bias slots
    o_ref : [TM, P]      f32   output slab:      gen | mean | var | 0
    """
    a = a_ref[...]  # [TM, P] f32

    def lin(h, idx):
        # Full padded-width matmul on the MXU (bf16 operands, f32 accumulate).
        acc = jnp.dot(h.astype(jnp.bfloat16), w_ref[idx],
                      preferred_element_type=jnp.float32)
        return acc + b_ref[idx]  # [1, P] bias broadcasts over [TM, P]

    # --- Encoder.fc_layer: Linear -> ReLU -> Linear -> ReLU ---
    h = jnp.maximum(lin(a, 0), 0.0)
    h = jnp.maximum(lin(h, 1), 0.0)

    # --- heads ---
    # slot 2: mean at lanes [di, di+L), var at lanes [di+L, di+2L)  (output layout)
    # slot 3: var  at lanes [di, di+L)                              (noise-aligned)
    mv = lin(h, 2)
    va = lin(h, 3)

    # --- reparameterization: z = mean + exp(0.5 * var) * eps ---
    # Lanes [di, di+L): mean + exp(0.5*var)*eps.  Other lanes carry x / var / 0,
    # which hit zero rows of the decoder weight, so they contribute nothing.
    z = mv + jnp.exp(0.5 * va) * a

    # --- Decoder: Linear -> ReLU -> Linear -> ReLU -> Linear -> Sigmoid ---
    d = jnp.maximum(lin(z, 4), 0.0)
    d = jnp.maximum(lin(d, 5), 0.0)
    g = jax.nn.sigmoid(lin(d, 6))  # real gen at lanes [0, di); 0.5 in padded lanes

    # Fused lane-dense output slab: gen | mean | var | 0.
    lane = jax.lax.broadcasted_iota(jnp.int32, g.shape, 1)
    o_ref[...] = jnp.where(lane < dim_image, g, mv).astype(o_ref.dtype)


def pack_params(params, dim_image, dim_hid, latent_dim):
    """Pack all weights/biases into two zero-padded, lane-dense slabs."""
    di, L = dim_image, latent_dim
    P = _round_up(max(dim_image + 2 * latent_dim, dim_hid, dim_image), 128)
    n_w = 7

    W = jnp.zeros((n_w, P, P), jnp.float32)
    B = jnp.zeros((n_w, 1, P), jnp.float32)

    def setw(W, i, w, r0, c0):
        return W.at[i, r0:r0 + w.shape[0], c0:c0 + w.shape[1]].set(w)

    def setb(B, i, b, c0):
        b = b.reshape(-1)
        return B.at[i, 0, c0:c0 + b.shape[0]].set(b)

    # Encoder fc_layer.
    W = setw(W, 0, params["w1"], 0, 0);        B = setb(B, 0, params["b1"], 0)
    W = setw(W, 1, params["w2"], 0, 0);        B = setb(B, 1, params["b2"], 0)
    # Fused mean|var head positioned at the output-slab lanes.
    W = setw(W, 2, params["wm"], 0, di);       B = setb(B, 2, params["bm"], di)
    W = setw(W, 2, params["wv"], 0, di + L);   B = setb(B, 2, params["bv"], di + L)
    # Var head aligned with the noise lanes (for the reparameterization).
    W = setw(W, 3, params["wv"], 0, di);       B = setb(B, 3, params["bv"], di)
    # Decoder (its first layer's real rows sit at the z lanes [di, di+L)).
    W = setw(W, 4, params["wd1"], di, 0);      B = setb(B, 4, params["bd1"], 0)
    W = setw(W, 5, params["wd2"], 0, 0);       B = setb(B, 5, params["bd2"], 0)
    W = setw(W, 6, params["wd3"], 0, 0);       B = setb(B, 6, params["bd3"], 0)

    return W.astype(jnp.bfloat16), B, P


def vae_forward(x, noise, params):
    """Returns (generate, mean, var) like the PyTorch model.forward."""
    Bsz, dim_image = x.shape
    dim_hid = params["w1"].shape[1]
    latent_dim = params["wm"].shape[1]
    di, L = dim_image, latent_dim

    w_stack, b_stack, P = pack_params(params, dim_image, dim_hid, latent_dim)
    n_w = w_stack.shape[0]

    # One lane-dense activation slab: x | eps | 0.
    a_slab = jnp.zeros((Bsz, P), jnp.float32)
    a_slab = a_slab.at[:, :di].set(x.astype(jnp.float32))
    a_slab = a_slab.at[:, di:di + L].set(noise.astype(jnp.float32))

    # Batch tiling: >=2 grid steps for B>=16 (lets v7x use both TensorCores),
    # tiles capped at 512 rows (plenty big for v6e/v5e to amortize per-step
    # overhead; working set stays << VMEM).
    if Bsz <= 8:
        TM = Bsz
    else:
        TM = min(512, _round_up(pl.cdiv(Bsz, 2), 8))
    grid = (pl.cdiv(Bsz, TM),)

    kernel = functools.partial(vae_kernel, dim_image=dim_image)

    out = pl.pallas_call(
        kernel,
        out_shape=jax.ShapeDtypeStruct((Bsz, P), jnp.float32),
        grid=grid,
        in_specs=[
            pl.BlockSpec((TM, P), lambda i: (i, 0)),          # activation slab
            pl.BlockSpec((n_w, P, P), lambda i: (0, 0, 0)),   # weight slab (bf16)
            pl.BlockSpec((n_w, 1, P), lambda i: (0, 0, 0)),   # bias slab (f32)
        ],
        out_specs=pl.BlockSpec((TM, P), lambda i: (i, 0)),    # gen|mean|var|0
        compiler_params=pltpu.CompilerParams(
            dimension_semantics=("parallel",)),
    )(a_slab, w_stack, b_stack)

    generate = out[:, :di]
    mean = out[:, di:di + L]
    var = out[:, di + L:di + 2 * L]
    return generate, mean, var


def init_params(key, dim_image, dim_hid, latent_dim):
    ks = jax.random.split(key, 7)

    def lin(k, fan_in, fan_out):
        # deterministic uniform init similar to torch's default Linear init
        bound = 1.0 / jnp.sqrt(fan_in)
        kw, kb = jax.random.split(k)
        w = jax.random.uniform(kw, (fan_in, fan_out), jnp.float32, -bound, bound)
        b = jax.random.uniform(kb, (1, fan_out), jnp.float32, -bound, bound)
        return w, b

    p = {}
    p["w1"], p["b1"] = lin(ks[0], dim_image, dim_hid)
    p["w2"], p["b2"] = lin(ks[1], dim_hid, dim_hid)
    p["wm"], p["bm"] = lin(ks[2], dim_hid, latent_dim)
    p["wv"], p["bv"] = lin(ks[3], dim_hid, latent_dim)
    p["wd1"], p["bd1"] = lin(ks[4], latent_dim, dim_hid)
    p["wd2"], p["bd2"] = lin(ks[5], dim_hid, dim_hid)
    p["wd3"], p["bd3"] = lin(ks[6], dim_hid, dim_image)
    return p


if __name__ == "__main__":
    B, dim_image, dim_hid, latent_dim = 8, 64, 32, 16

    key = jax.random.PRNGKey(0)
    kx, kn, kp = jax.random.split(key, 3)

    x = jax.random.normal(kx, (B, dim_image), jnp.float32)
    noise = jax.random.normal(kn, (B, latent_dim), jnp.float32)  # torch.randn_like(var)
    params = init_params(kp, dim_image, dim_hid, latent_dim)

    generate, mean, var = vae_forward(x, noise, params)
    jax.block_until_ready((generate, mean, var))

    assert generate.shape == (B, dim_image)
    assert mean.shape == (B, latent_dim)
    assert var.shape == (B, latent_dim)

    # Pure-JAX f32 reference; kernel uses bf16 MXU operands, so tolerances are
    # relaxed accordingly.
    def ref_forward(x, noise, p):
        h = jnp.maximum(x @ p["w1"] + p["b1"], 0.0)
        h = jnp.maximum(h @ p["w2"] + p["b2"], 0.0)
        mean = h @ p["wm"] + p["bm"]
        var = h @ p["wv"] + p["bv"]
        z = mean + jnp.exp(0.5 * var) * noise
        d = jnp.maximum(z @ p["wd1"] + p["bd1"], 0.0)
        d = jnp.maximum(d @ p["wd2"] + p["bd2"], 0.0)
        g = jax.nn.sigmoid(d @ p["wd3"] + p["bd3"])
        return g, mean, var

    g_ref, m_ref, v_ref = ref_forward(x, noise, params)
    assert jnp.allclose(generate, g_ref, atol=3e-2, rtol=3e-2)
    assert jnp.allclose(mean, m_ref, atol=3e-2, rtol=3e-2)
    assert jnp.allclose(var, v_ref, atol=3e-2, rtol=3e-2)

    print("KERNEL_OK")
</pallas_src>

<mosaic_0001>
module attributes {stable_mosaic.version = 11 : i64} {
  func.func @vae_kernel(%arg0: i32, %arg1: memref<8x128xf32, #tpu.memory_space<vmem>>, %arg2: memref<7x128x128xbf16, #tpu.memory_space<vmem>>, %arg3: memref<7x1x128xf32, #tpu.memory_space<vmem>>, %arg4: memref<8x128xf32, #tpu.memory_space<vmem>>) attributes {dimension_semantics = [#tpu.dimension_semantics<parallel>], iteration_bounds = array<i64: 1>, scalar_prefetch = 0 : i64, scratch_operands = 0 : i64, tpu.core_type = #tpu.core_type<tc>, window_params = [{transform_indices = @transform_0, window_bounds = array<i64: 8, 128>}, {pipeline_mode = #tpu.pipeline_mode<synchronous>, transform_indices = @transform_1, window_bounds = array<i64: 7, 128, 128>}, {pipeline_mode = #tpu.pipeline_mode<synchronous>, transform_indices = @transform_2, window_bounds = array<i64: 7, 1, 128>}, {transform_indices = @transform_3, window_bounds = array<i64: 8, 128>}]} {
    %c0 = arith.constant 0 : index
    %c0_0 = arith.constant 0 : index
    %0 = vector.load %arg1[%c0, %c0_0] : memref<8x128xf32, #tpu.memory_space<vmem>>, vector<8x128xf32>
    %1 = arith.truncf %0 : vector<8x128xf32> to vector<8x128xbf16>
    %c0_1 = arith.constant 0 : index
    %c0_2 = arith.constant 0 : index
    %c0_3 = arith.constant 0 : index
    %2 = vector.load %arg2[%c0_1, %c0_2, %c0_3] : memref<7x128x128xbf16, #tpu.memory_space<vmem>>, vector<1x128x128xbf16>
    %3 = vector.shape_cast %2 : vector<1x128x128xbf16> to vector<128x128xbf16>
    %cst = arith.constant dense<0.000000e+00> : vector<8x128xf32>
    %4 = tpu.matmul %1, %3, %cst {dimension_numbers = #tpu.dot_dimension_numbers<[1], [0], [0], [1], [0, 0, 1, 1], [], []>} : vector<8x128xbf16>, vector<128x128xbf16>, vector<8x128xf32> -> vector<8x128xf32>
    %c0_4 = arith.constant 0 : index
    %c0_5 = arith.constant 0 : index
    %c0_6 = arith.constant 0 : index
    %5 = vector.load %arg3[%c0_4, %c0_5, %c0_6] : memref<7x1x128xf32, #tpu.memory_space<vmem>>, vector<1x1x128xf32>
    %6 = vector.shape_cast %5 : vector<1x1x128xf32> to vector<1x128xf32>
    %7 = vector.broadcast %6 : vector<1x128xf32> to vector<8x128xf32>
    %8 = arith.addf %4, %7 : vector<8x128xf32>
    %cst_7 = arith.constant 0.000000e+00 : f32
    %9 = vector.broadcast %cst_7 : f32 to vector<8x128xf32>
    %10 = arith.maximumf %8, %9 : vector<8x128xf32>
    %11 = arith.truncf %10 : vector<8x128xf32> to vector<8x128xbf16>
    %c1 = arith.constant 1 : index
    %c0_8 = arith.constant 0 : index
    %c0_9 = arith.constant 0 : index
    %12 = vector.load %arg2[%c1, %c0_8, %c0_9] : memref<7x128x128xbf16, #tpu.memory_space<vmem>>, vector<1x128x128xbf16>
    %13 = vector.shape_cast %12 : vector<1x128x128xbf16> to vector<128x128xbf16>
    %cst_10 = arith.constant dense<0.000000e+00> : vector<8x128xf32>
    %14 = tpu.matmul %11, %13, %cst_10 {dimension_numbers = #tpu.dot_dimension_numbers<[1], [0], [0], [1], [0, 0, 1, 1], [], []>} : vector<8x128xbf16>, vector<128x128xbf16>, vector<8x128xf32> -> vector<8x128xf32>
    %c1_11 = arith.constant 1 : index
    %c0_12 = arith.constant 0 : index
    %c0_13 = arith.constant 0 : index
    %15 = vector.load %arg3[%c1_11, %c0_12, %c0_13] : memref<7x1x128xf32, #tpu.memory_space<vmem>>, vector<1x1x128xf32>
    %16 = vector.shape_cast %15 : vector<1x1x128xf32> to vector<1x128xf32>
    %17 = vector.broadcast %16 : vector<1x128xf32> to vector<8x128xf32>
    %18 = arith.addf %14, %17 : vector<8x128xf32>
    %cst_14 = arith.constant 0.000000e+00 : f32
    %19 = vector.broadcast %cst_14 : f32 to vector<8x128xf32>
    %20 = arith.maximumf %18, %19 : vector<8x128xf32>
    %21 = arith.truncf %20 : vector<8x128xf32> to vector<8x128xbf16>
    %c2 = arith.constant 2 : index
    %c0_15 = arith.constant 0 : index
    %c0_16 = arith.constant 0 : index
    %22 = vector.load %arg2[%c2, %c0_15, %c0_16] : memref<7x128x128xbf16, #tpu.memory_space<vmem>>, vector<1x128x128xbf16>
    %23 = vector.shape_cast %22 : vector<1x128x128xbf16> to vector<128x128xbf16>
    %cst_17 = arith.constant dense<0.000000e+00> : vector<8x128xf32>
    %24 = tpu.matmul %21, %23, %cst_17 {dimension_numbers = #tpu.dot_dimension_numbers<[1], [0], [0], [1], [0, 0, 1, 1], [], []>} : vector<8x128xbf16>, vector<128x128xbf16>, vector<8x128xf32> -> vector<8x128xf32>
    %c2_18 = arith.constant 2 : index
    %c0_19 = arith.constant 0 : index
    %c0_20 = arith.constant 0 : index
    %25 = vector.load %arg3[%c2_18, %c0_19, %c0_20] : memref<7x1x128xf32, #tpu.memory_space<vmem>>, vector<1x1x128xf32>
    %26 = vector.shape_cast %25 : vector<1x1x128xf32> to vector<1x128xf32>
    %27 = vector.broadcast %26 : vector<1x128xf32> to vector<8x128xf32>
    %28 = arith.addf %24, %27 : vector<8x128xf32>
    %29 = arith.truncf %20 : vector<8x128xf32> to vector<8x128xbf16>
    %c3 = arith.constant 3 : index
    %c0_21 = arith.constant 0 : index
    %c0_22 = arith.constant 0 : index
    %30 = vector.load %arg2[%c3, %c0_21, %c0_22] : memref<7x128x128xbf16, #tpu.memory_space<vmem>>, vector<1x128x128xbf16>
    %31 = vector.shape_cast %30 : vector<1x128x128xbf16> to vector<128x128xbf16>
    %cst_23 = arith.constant dense<0.000000e+00> : vector<8x128xf32>
    %32 = tpu.matmul %29, %31, %cst_23 {dimension_numbers = #tpu.dot_dimension_numbers<[1], [0], [0], [1], [0, 0, 1, 1], [], []>} : vector<8x128xbf16>, vector<128x128xbf16>, vector<8x128xf32> -> vector<8x128xf32>
    %c3_24 = arith.constant 3 : index
    %c0_25 = arith.constant 0 : index
    %c0_26 = arith.constant 0 : index
    %33 = vector.load %arg3[%c3_24, %c0_25, %c0_26] : memref<7x1x128xf32, #tpu.memory_space<vmem>>, vector<1x1x128xf32>
    %34 = vector.shape_cast %33 : vector<1x1x128xf32> to vector<1x128xf32>
    %35 = vector.broadcast %34 : vector<1x128xf32> to vector<8x128xf32>
    %36 = arith.addf %32, %35 : vector<8x128xf32>
    %cst_27 = arith.constant 5.000000e-01 : f32
    %37 = vector.broadcast %cst_27 : f32 to vector<8x128xf32>
    %38 = arith.mulf %37, %36 : vector<8x128xf32>
    %39 = math.exp %38 : vector<8x128xf32>
    %40 = arith.mulf %39, %0 : vector<8x128xf32>
    %41 = arith.addf %28, %40 : vector<8x128xf32>
    %42 = arith.truncf %41 : vector<8x128xf32> to vector<8x128xbf16>
    %c4 = arith.constant 4 : index
    %c0_28 = arith.constant 0 : index
    %c0_29 = arith.constant 0 : index
    %43 = vector.load %arg2[%c4, %c0_28, %c0_29] : memref<7x128x128xbf16, #tpu.memory_space<vmem>>, vector<1x128x128xbf16>
    %44 = vector.shape_cast %43 : vector<1x128x128xbf16> to vector<128x128xbf16>
    %cst_30 = arith.constant dense<0.000000e+00> : vector<8x128xf32>
    %45 = tpu.matmul %42, %44, %cst_30 {dimension_numbers = #tpu.dot_dimension_numbers<[1], [0], [0], [1], [0, 0, 1, 1], [], []>} : vector<8x128xbf16>, vector<128x128xbf16>, vector<8x128xf32> -> vector<8x128xf32>
    %c4_31 = arith.constant 4 : index
    %c0_32 = arith.constant 0 : index
    %c0_33 = arith.constant 0 : index
    %46 = vector.load %arg3[%c4_31, %c0_32, %c0_33] : memref<7x1x128xf32, #tpu.memory_space<vmem>>, vector<1x1x128xf32>
    %47 = vector.shape_cast %46 : vector<1x1x128xf32> to vector<1x128xf32>
    %48 = vector.broadcast %47 : vector<1x128xf32> to vector<8x128xf32>
    %49 = arith.addf %45, %48 : vector<8x128xf32>
    %cst_34 = arith.constant 0.000000e+00 : f32
    %50 = vector.broadcast %cst_34 : f32 to vector<8x128xf32>
    %51 = arith.maximumf %49, %50 : vector<8x128xf32>
    %52 = arith.truncf %51 : vector<8x128xf32> to vector<8x128xbf16>
    %c5 = arith.constant 5 : index
    %c0_35 = arith.constant 0 : index
    %c0_36 = arith.constant 0 : index
    %53 = vector.load %arg2[%c5, %c0_35, %c0_36] : memref<7x128x128xbf16, #tpu.memory_space<vmem>>, vector<1x128x128xbf16>
    %54 = vector.shape_cast %53 : vector<1x128x128xbf16> to vector<128x128xbf16>
    %cst_37 = arith.constant dense<0.000000e+00> : vector<8x128xf32>
    %55 = tpu.matmul %52, %54, %cst_37 {dimension_numbers = #tpu.dot_dimension_numbers<[1], [0], [0], [1], [0, 0, 1, 1], [], []>} : vector<8x128xbf16>, vector<128x128xbf16>, vector<8x128xf32> -> vector<8x128xf32>
    %c5_38 = arith.constant 5 : index
    %c0_39 = arith.constant 0 : index
    %c0_40 = arith.constant 0 : index
    %56 = vector.load %arg3[%c5_38, %c0_39, %c0_40] : memref<7x1x128xf32, #tpu.memory_space<vmem>>, vector<1x1x128xf32>
    %57 = vector.shape_cast %56 : vector<1x1x128xf32> to vector<1x128xf32>
    %58 = vector.broadcast %57 : vector<1x128xf32> to vector<8x128xf32>
    %59 = arith.addf %55, %58 : vector<8x128xf32>
    %cst_41 = arith.constant 0.000000e+00 : f32
    %60 = vector.broadcast %cst_41 : f32 to vector<8x128xf32>
    %61 = arith.maximumf %59, %60 : vector<8x128xf32>
    %62 = arith.truncf %61 : vector<8x128xf32> to vector<8x128xbf16>
    %c6 = arith.constant 6 : index
    %c0_42 = arith.constant 0 : index
    %c0_43 = arith.constant 0 : index
    %63 = vector.load %arg2[%c6, %c0_42, %c0_43] : memref<7x128x128xbf16, #tpu.memory_space<vmem>>, vector<1x128x128xbf16>
    %64 = vector.shape_cast %63 : vector<1x128x128xbf16> to vector<128x128xbf16>
    %cst_44 = arith.constant dense<0.000000e+00> : vector<8x128xf32>
    %65 = tpu.matmul %62, %64, %cst_44 {dimension_numbers = #tpu.dot_dimension_numbers<[1], [0], [0], [1], [0, 0, 1, 1], [], []>} : vector<8x128xbf16>, vector<128x128xbf16>, vector<8x128xf32> -> vector<8x128xf32>
    %c6_45 = arith.constant 6 : index
    %c0_46 = arith.constant 0 : index
    %c0_47 = arith.constant 0 : index
    %66 = vector.load %arg3[%c6_45, %c0_46, %c0_47] : memref<7x1x128xf32, #tpu.memory_space<vmem>>, vector<1x1x128xf32>
    %67 = vector.shape_cast %66 : vector<1x1x128xf32> to vector<1x128xf32>
    %68 = vector.broadcast %67 : vector<1x128xf32> to vector<8x128xf32>
    %69 = arith.addf %65, %68 : vector<8x128xf32>
    %70 = arith.negf %69 : vector<8x128xf32>
    %71 = math.exp %70 : vector<8x128xf32>
    %cst_48 = arith.constant 1.000000e+00 : f32
    %72 = vector.broadcast %cst_48 : f32 to vector<8x128xf32>
    %73 = arith.addf %72, %71 : vector<8x128xf32>
    %74 = arith.divf %72, %73 : vector<8x128xf32>
    %75 = tpu.iota {dimensions = array<i32: 1>} : vector<8x128xi32>
    %c64_i32 = arith.constant 64 : i32
    %76 = vector.broadcast %c64_i32 : i32 to vector<8x128xi32>
    %77 = arith.cmpi slt, %75, %76 : vector<8x128xi32>
    %78 = arith.select %77, %74, %28 : vector<8x128xi1>, vector<8x128xf32>
    %c0_49 = arith.constant 0 : index
    %c0_50 = arith.constant 0 : index
    %79 = vector.load %arg4[%c0_49, %c0_50] : memref<8x128xf32, #tpu.memory_space<vmem>>, vector<8x128xf32>
    tpu.vector_store %arg4[%c0_49, %c0_50], %78 {strides = array<i32>} : memref<8x128xf32, #tpu.memory_space<vmem>>, vector<8x128xf32>,
    return
  }
  func.func @transform_0(%arg0: i32) -> (i32, i32) {
    %c0_i32 = arith.constant 0 : i32
    %c0_i32_0 = arith.constant 0 : i32
    return %arg0, %c0_i32 : i32, i32
  }
  func.func @transform_1(%arg0: i32) -> (i32, i32, i32) {
    %c0_i32 = arith.constant 0 : i32
    %c0_i32_0 = arith.constant 0 : i32
    %c0_i32_1 = arith.constant 0 : i32
    %c0_i32_2 = arith.constant 0 : i32
    return %c0_i32, %c0_i32_0, %c0_i32_1 : i32, i32, i32
  }
  func.func @transform_2(%arg0: i32) -> (i32, i32, i32) {
    %c0_i32 = arith.constant 0 : i32
    %c0_i32_0 = arith.constant 0 : i32
    %c0_i32_1 = arith.constant 0 : i32
    %c0_i32_2 = arith.constant 0 : i32
    return %c0_i32, %c0_i32_0, %c0_i32_1 : i32, i32, i32
  }
  func.func @transform_3(%arg0: i32) -> (i32, i32) {
    %c0_i32 = arith.constant 0 : i32
    %c0_i32_0 = arith.constant 0 : i32
    return %arg0, %c0_i32 : i32, i32
  }
}

</mosaic_0001>

<bundles_post_ra>
// kernel: tpu_custom_call.1
= control target key start
LH: loop header
LB: loop body
LE: loop exit
PB: predicated region body
PF: predicated region fallthrough
CT: control target
= control target key end

     0   :  { %8 = vsyncpa [#allocation3], 0  ;;  %s1458_s0 = inlined_call_operand.hbm [shape: f32[8,128], index: 0, kind: input, shape index: {}]   ;;  %s1459_s1 = inlined_call_operand.hbm [shape: bf16[7,128,128], index: 1, kind: input, shape index: {}]   ;;  %s1460_s2 = inlined_call_operand.vmem [shape: f32[7,1,128], index: 2, kind: input, shape index: {}]   ;;  %s1461_s3 = inlined_call_operand.hbm [shape: f32[8,128], index: 3, kind: output, shape index: {}]  }
   0x1   :  { %9 = vsyncpa [#allocation6], 0 }
   0x2   :  { %10 = vsyncpa [#allocation4], 0  ;;  %s1288_s12 = smov [#allocation2]   ;;  %s1289_s14 = smov [#allocation5]  }
   0x3   :  { %s17_s13 = sshll.u32 %s1288_s12, 4  ;;  %s26_s15 = sshll.u32 %s1289_s14, 4  ;;  %s18_s13 = int_to_ptr.vmem [resolvable:$true] %s17_s13  ;;  %s1315_s15 = int_to_ptr.vmem [resolvable:$true] %s26_s15 }
   0x4   :  { %s1216_s18 = scalar_lea.hbm %s1458_s0, 128 }
   0x5   :  { %p1217_p0 = scmp.ne.s32.totalorder %s1458_s0, %s1216_s18  ;;  %p1220_p1 = scmp.lt.u32.totalorder %s1216_s18, %s1458_s0 }
   0x7   :  { %p1222_p2 = pnand %p1220_p1, %p1217_p0 }
   0x9   :  { %1225 = shalt.err (!%p1222_p2)
}
   0xa   :  { %s1226_s23 = scalar_lea.vmem %s18_s13, 128  ;;  %p1231_p4 = scmp.lt.s32.totalorder %s18_s13, %s18_s13 }
   0xb   :  { %p1227_p3 = scmp.ne.s32.totalorder %s18_s13, %s1226_s23  ;;  %p1232_p5 = scmp.lt.s32.totalorder %s1226_s23, %s1226_s23 }
   0xd   :  { %p1233_p6 = por %p1232_p5, %p1231_p4 }
   0xf   :  { %p1234_p7 = pnand %p1233_p6, %p1227_p3 }
  0x11   :  { %1237 = shalt.err (!%p1234_p7)
}
  0x12   :  { %20 = dma.hbm_to_vmem [thread:$0]  %s1458_s0, 128, %s18_s13, [#allocation3]  }
  0x13   :  { %s1238_s28 = scalar_lea.hbm %s1459_s1, 7168 }
  0x14   :  { %p1239_p8 = scmp.ne.s32.totalorder %s1459_s1, %s1238_s28  ;;  %p1242_p9 = scmp.lt.u32.totalorder %s1238_s28, %s1459_s1 }
  0x16   :  { %p1244_p10 = pnand %p1242_p9, %p1239_p8 }
  0x18   :  { %1247 = shalt.err (!%p1244_p10)
}
  0x19   :  { %s1248_s6 = scalar_lea.vmem %s1315_s15, 7168  ;;  %p1253_p12 = scmp.lt.s32.totalorder %s1315_s15, %s1315_s15 }
  0x1a   :  { %p1249_p11 = scmp.ne.s32.totalorder %s1315_s15, %s1248_s6  ;;  %p1254_p13 = scmp.lt.s32.totalorder %s1248_s6, %s1248_s6 }
  0x1c   :  { %p1255_p0 = por %p1254_p13, %p1253_p12 }
  0x1e   :  { %p1256_p1 = pnand %p1255_p0, %p1249_p11 }
  0x20   :  { %1259 = shalt.err (!%p1256_p1)
}
  0x21   :  { %s1290_s0 = smov 64   ;;  %s1291_s7 = smov 4  }
  0x22   :  { %32 = dma.hbm_to_vmem [thread:$0]  %s1459_s1, 7168, %s1315_s15, [#allocation6], %s1290_s0, %s1290_s0, %s1291_s7  }
  0x23   :  { %1282 = dma.done.wait [#allocation3], 128  }
  0x24   :  { %1283 = vsyncadd [#allocation3], 4294967168 }
  0x25   :  { %1284 = dma.done.wait [#allocation6], 7168  }
  0x26   :  { %1285 = vsyncadd [#allocation6], 4294960128  ;;  %v1292_v0 = vmov 0.0   ;;  %vm1293_vm0 = vmmov 0   ;;  %v1154_v1 = vld [vmem:[#allocation5] sm:$0xff]   ;;  %v1155_v2 = vld [vmem:[#allocation5 + $0x8] sm:$0xff]  }
  0x27   :  { %1007 = vmatprep.subr.bf16.mxu0 %v1292_v0  ;;  %1023 = vmatprep.mubr.msk.bf16.mxu0 %vm1293_vm0, %v1292_v0  ;;  %v1156_v3 = vld [vmem:[#allocation5 + $0x10] sm:$0xff]   ;;  %v1162_v4 = vld [vmem:[#allocation5 + $0x40] sm:$0xff]   ;;  %v1157_v5 = vld [vmem:[#allocation5 + $0x18] sm:$0xff]   ;;  %s1294_s23 = smov [#allocation7]  }
  0x28   :  { %1027 = vmatprep.subr.bf16.mxu1 %v1292_v0  ;;  %1043 = vmatprep.mubr.msk.bf16.mxu1 %vm1293_vm0, %v1292_v0  ;;  %v1163_v6 = vld [vmem:[#allocation5 + $0x48] sm:$0xff]   ;;  %v1158_v7 = vld [vmem:[#allocation5 + $0x20] sm:$0xff]   ;;  %v1164_v8 = vld [vmem:[#allocation5 + $0x50] sm:$0xff]   ;;  %s864_s24 = sshll.u32 %s1294_s23, 4  ;;  %s865_s24 = int_to_ptr.vmem [resolvable:$true] %s864_s24 }
  0x29   :  { %1008 = vmatpush3.bf16.msra.mxu0 %v1154_v1  ;;  %1028 = vmatpush3.bf16.msra.mxu1 %v1162_v4  ;;  %v1159_v9 = vld [vmem:[#allocation5 + $0x28] sm:$0xff]   ;;  %v1165_v10 = vld [vmem:[#allocation5 + $0x58] sm:$0xff]   ;;  %v1160_v11 = vld [vmem:[#allocation5 + $0x30] sm:$0xff]   ;;  %p1265_p3 = scmp.lt.s32.totalorder %s865_s24, %s865_s24 }
  0x2a   :  { %1009 = vmatprep.subr.bf16.mxu0 %v1292_v0  ;;  %1029 = vmatprep.subr.bf16.mxu1 %v1292_v0  ;;  %v1166_v12 = vld [vmem:[#allocation5 + $0x60] sm:$0xff]   ;;  %v1161_v13 = vld [vmem:[#allocation5 + $0x38] sm:$0xff]   ;;  %v1167_v15 = vld [vmem:[#allocation5 + $0x68] sm:$0xff]  }
  0x2b   :  { %v1361_v14 = vld [vmem:[#allocation2] sm:$0xff]  ;;  %v1168_v17 = vld [vmem:[#allocation5 + $0x70] sm:$0xff]   ;;  %v1170_v19 = vld [vmem:[#allocation5 + $0x80] sm:$0xff]  }
  0x2c   :  { %v43_v16 = vpack.c.bf16 %v1361_v14, %v1361_v14  ;;  %v1169_v18 = vld [vmem:[#allocation5 + $0x78] sm:$0xff]   ;;  %v1172_v20 = vld [vmem:[#allocation5 + $0x88] sm:$0xff]   ;;  %v1174_v21 = vld [vmem:[#allocation5 + $0x90] sm:$0xff]  }
  0x2d   :  { %1010 = vmatpush3.bf16.msra.mxu0 %v1155_v2  ;;  %1030 = vmatpush3.bf16.msra.mxu1 %v1163_v6  ;;  %v1176_v22 = vld [vmem:[#allocation5 + $0x98] sm:$0xff]   ;;  %v1178_v23 = vld [vmem:[#allocation5 + $0xa0] sm:$0xff]   ;;  %v1180_v24 = vld [vmem:[#allocation5 + $0xa8] sm:$0xff]  }
  0x2e   :  { %1011 = vmatprep.subr.bf16.mxu0 %v1292_v0  ;;  %1031 = vmatprep.subr.bf16.mxu1 %v1292_v0  ;;  %v874_v25 = vld [vmem:[%s1460_s2] ss:$0 sm:$0xff]  ;;  %v1171_v32 = vld [vmem:[#allocation5 + $0xc0] sm:$0xff]   ;;  %v1173_v34 = vld [vmem:[#allocation5 + $0xc8] sm:$0xff]  }
  0x2f   :  { %v1175_v35 = vld [vmem:[#allocation5 + $0xd0] sm:$0xff]   ;;  %v1177_v36 = vld [vmem:[#allocation5 + $0xd8] sm:$0xff]   ;;  %v1179_v37 = vld [vmem:[#allocation5 + $0xe0] sm:$0xff]  }
  0x30   :  { %v1181_v38 = vld [vmem:[#allocation5 + $0xe8] sm:$0xff]   ;;  %v1182_v39 = vld [vmem:[#allocation5 + $0xb0] sm:$0xff]   ;;  %v1184_v41 = vld [vmem:[#allocation5 + $0xb8] sm:$0xff]  }
  0x31   :  { %1012 = vmatpush3.bf16.msra.mxu0 %v1156_v3  ;;  %1032 = vmatpush3.bf16.msra.mxu1 %v1164_v8  ;;  %v1183_v40 = vld [vmem:[#allocation5 + $0xf0] sm:$0xff]   ;;  %v1185_v42 = vld [vmem:[#allocation5 + $0xf8] sm:$0xff]   ;;  %v1186_v50 = vld [vmem:[#allocation5 + $0x100] sm:$0xff]  }
  0x32   :  { %1013 = vmatprep.subr.bf16.mxu0 %v1292_v0  ;;  %1033 = vmatprep.subr.bf16.mxu1 %v1292_v0  ;;  %v884_v43 = vld [vmem:[%s1460_s2 + $0x1] ss:$0 sm:$0xff]  ;;  %v1187_v52 = vld [vmem:[#allocation5 + $0x108] sm:$0xff]   ;;  %v1188_v53 = vld [vmem:[#allocation5 + $0x110] sm:$0xff]  }
  0x33   :  { %v1189_v54 = vld [vmem:[#allocation5 + $0x118] sm:$0xff]   ;;  %v1190_v55 = vld [vmem:[#allocation5 + $0x120] sm:$0xff]   ;;  %v1191_v56 = vld [vmem:[#allocation5 + $0x128] sm:$0xff]  }
  0x34   :  { %v1192_v57 = vld [vmem:[#allocation5 + $0x130] sm:$0xff]   ;;  %v1193_v58 = vld [vmem:[#allocation5 + $0x138] sm:$0xff]   ;;  %v1194_v59 = vld [vmem:[#allocation5 + $0x140] sm:$0xff]  }
  0x35   :  { %1014 = vmatpush3.bf16.msra.mxu0 %v1157_v5  ;;  %1034 = vmatpush3.bf16.msra.mxu1 %v1165_v10  ;;  %v1195_v60 = vld [vmem:[#allocation5 + $0x148] sm:$0xff]   ;;  %v1196_v61 = vld [vmem:[#allocation5 + $0x150] sm:$0xff]   ;;  %v1197_v62 = vld [vmem:[#allocation5 + $0x158] sm:$0xff]  }
  0x36   :  { %1015 = vmatprep.subr.bf16.mxu0 %v1292_v0  ;;  %1035 = vmatprep.subr.bf16.mxu1 %v1292_v0  ;;  %v1198_v63 = vld [vmem:[#allocation5 + $0x160] sm:$0xff]   ;;  %v1199_v1 = vld [vmem:[#allocation5 + $0x168] sm:$0xff]   ;;  %v904_v2 = vld [vmem:[%s1460_s2 + $0x3] ss:$0 sm:$0xff] }
  0x39   :  { %1016 = vmatpush3.bf16.msra.mxu0 %v1158_v7  ;;  %1036 = vmatpush3.bf16.msra.mxu1 %v1166_v12 }
  0x3a   :  { %1017 = vmatprep.subr.bf16.mxu0 %v1292_v0  ;;  %1037 = vmatprep.subr.bf16.mxu1 %v1292_v0 }
  0x3d   :  { %1018 = vmatpush3.bf16.msra.mxu0 %v1159_v9  ;;  %1038 = vmatpush3.bf16.msra.mxu1 %v1167_v15  ;;  %v894_v15 = vld [vmem:[%s1460_s2 + $0x2] ss:$0 sm:$0xff] }
  0x3e   :  { %1019 = vmatprep.subr.bf16.mxu0 %v1292_v0  ;;  %1039 = vmatprep.subr.bf16.mxu1 %v1292_v0 }
  0x41   :  { %1020 = vmatpush3.bf16.msra.mxu0 %v1160_v11  ;;  %1040 = vmatpush3.bf16.msra.mxu1 %v1168_v17 }
  0x42   :  { %1021 = vmatprep.subr.bf16.mxu0 %v1292_v0  ;;  %1041 = vmatprep.subr.bf16.mxu1 %v1292_v0 }
  0x45   :  { %1022 = vmatpush3.bf16.msra.mxu0 %v1161_v13  ;;  %1042 = vmatpush3.bf16.msra.mxu1 %v1169_v18 }
  0x46   :  { %1047 = vmatprep.subr.bf16.mxu0 %v1292_v0  ;;  %1067 = vmatprep.subr.bf16.mxu1 %v1292_v0 }
  0x48   :  { %1024 = vmatmul.mubr.bf16.vlgmr.msra.gmra.mrb[0].mxu0 %v43_v16 }
  0x49   :  { %1063 = vmatprep.mubr.msk.bf16.mxu0 %vm1293_vm0, %v1292_v0  ;;  %1048 = vmatpush3.bf16.msra.mxu0 %v1170_v19 }
  0x4a   :  { %1049 = vmatprep.subr.bf16.mxu0 %v1292_v0 }
  0x4d   :  { %1050 = vmatpush3.bf16.msra.mxu0 %v1172_v20 }
  0x4e   :  { %1051 = vmatprep.subr.bf16.mxu0 %v1292_v0 }
  0x51   :  { %1052 = vmatpush3.bf16.msra.mxu0 %v1174_v21  ;;  %v1200_v21 = vld [vmem:[#allocation5 + $0x170] sm:$0xff]  }
  0x52   :  { %1053 = vmatprep.subr.bf16.mxu0 %v1292_v0 }
  0x55   :  { %1054 = vmatpush3.bf16.msra.mxu0 %v1176_v22  ;;  %v1201_v22 = vld [vmem:[#allocation5 + $0x178] sm:$0xff]  }
  0x56   :  { %1055 = vmatprep.subr.bf16.mxu0 %v1292_v0 }
  0x59   :  { %1056 = vmatpush3.bf16.msra.mxu0 %v1178_v23  ;;  %v1202_v23 = vld [vmem:[#allocation5 + $0x180] sm:$0xff]  }
  0x5a   :  { %1057 = vmatprep.subr.bf16.mxu0 %v1292_v0 }
  0x5d   :  { %1058 = vmatpush3.bf16.msra.mxu0 %v1180_v24  ;;  %v1203_v24 = vld [vmem:[#allocation5 + $0x188] sm:$0xff]  }
  0x5e   :  { %1059 = vmatprep.subr.bf16.mxu0 %v1292_v0 }
  0x61   :  { %1060 = vmatpush3.bf16.msra.mxu0 %v1182_v39 }
  0x62   :  { %1061 = vmatprep.subr.bf16.mxu0 %v1292_v0 }
  0x65   :  { %1062 = vmatpush3.bf16.msra.mxu0 %v1184_v41 }
  0x66   :  { %1087 = vmatprep.subr.bf16.mxu0 %v1292_v0 }
 0x11b   :  { %v149_v26 = vpop.f32.mrb[0].mxu0 }
 0x11c   :  { %v150_v27 = vadd.f32 %v874_v25, %v149_v26  ;;  %v1025_v28 = vpop.f32.mrb[1].mxu0  ;;  %v1205_v25 = vld [vmem:[#allocation5 + $0x198] sm:$0xff]   ;;  %v1206_v26 = vld [vmem:[#allocation5 + $0x1a0] sm:$0xff]  }
 0x11d   :  { %v152_v29 = vpop.f32.mrb[2].mxu0  ;;  %v914_v28 = vld [vmem:[%s1460_s2 + $0x4] ss:$0 sm:$0xff] }
 0x11e   :  { %v155_v30 = vmax.f32 %v150_v27, 0.0  ;;  %v1026_v31 = vpop.f32.mrb[3].mxu0  ;;  %v1207_v27 = vld [vmem:[#allocation5 + $0x1a8] sm:$0xff]  }
 0x120   :  { %v156_v33 = vpack.c.bf16 %v155_v30, %v155_v30 }
 0x122   :  { %1044 = vmatmul.mubr.bf16.vlgmr.msra.gmra.mrb[0].mxu1 %v156_v33 }
 0x123   :  { %1068 = vmatpush3.bf16.msra.mxu1 %v1171_v32  ;;  %1083 = vmatprep.mubr.msk.bf16.mxu1 %vm1293_vm0, %v1292_v0 }
 0x124   :  { %1069 = vmatprep.subr.bf16.mxu1 %v1292_v0 }
 0x127   :  { %1070 = vmatpush3.bf16.msra.mxu1 %v1173_v34 }
 0x128   :  { %1071 = vmatprep.subr.bf16.mxu1 %v1292_v0 }
 0x12b   :  { %1072 = vmatpush3.bf16.msra.mxu1 %v1175_v35 }
 0x12c   :  { %1073 = vmatprep.subr.bf16.mxu1 %v1292_v0 }
 0x12f   :  { %1074 = vmatpush3.bf16.msra.mxu1 %v1177_v36  ;;  %v1208_v36 = vld [vmem:[#allocation5 + $0x1b0] sm:$0xff]  }
 0x130   :  { %1075 = vmatprep.subr.bf16.mxu1 %v1292_v0 }
 0x133   :  { %1076 = vmatpush3.bf16.msra.mxu1 %v1179_v37  ;;  %v1209_v37 = vld [vmem:[#allocation5 + $0x1b8] sm:$0xff]  }
 0x134   :  { %1077 = vmatprep.subr.bf16.mxu1 %v1292_v0 }
 0x137   :  { %1078 = vmatpush3.bf16.msra.mxu1 %v1181_v38  ;;  %v924_v38 = vld [vmem:[%s1460_s2 + $0x5] ss:$0 sm:$0xff] }
 0x138   :  { %1079 = vmatprep.subr.bf16.mxu1 %v1292_v0 }
 0x13b   :  { %1080 = vmatpush3.bf16.msra.mxu1 %v1183_v40 }
 0x13c   :  { %1081 = vmatprep.subr.bf16.mxu1 %v1292_v0 }
 0x13f   :  { %1082 = vmatpush3.bf16.msra.mxu1 %v1185_v42 }
 0x140   :  { %1107 = vmatprep.subr.bf16.mxu1 %v1292_v0 }
 0x1f5   :  { %v264_v44 = vpop.f32.mrb[0].mxu1 }
 0x1f6   :  { %v265_v45 = vadd.f32 %v884_v43, %v264_v44  ;;  %v1045_v46 = vpop.f32.mrb[1].mxu1 }
 0x1f7   :  { %v267_v47 = vpop.f32.mrb[2].mxu1  ;;  %v934_v46 = vld [vmem:[%s1460_s2 + $0x6] ss:$0 sm:$0xff]  ;;  %s1260_s2 = scalar_lea.vmem %s865_s24, 128 }
 0x1f8   :  { %v270_v48 = vmax.f32 %v265_v45, 0.0  ;;  %v1046_v49 = vpop.f32.mrb[3].mxu1  ;;  %p1261_p2 = scmp.ne.s32.totalorder %s865_s24, %s1260_s2  ;;  %p1266_p4 = scmp.lt.s32.totalorder %s1260_s2, %s1260_s2 }
 0x1fa   :  { %v271_v51 = vpack.c.bf16 %v270_v48, %v270_v48  ;;  %p1267_p5 = por %p1266_p4, %p1265_p3 }
 0x1fc   :  { %1064 = vmatmul.mubr.bf16.vlgmr.msra.gmra.mrb[4].mxu0 %v271_v51  ;;  %1084 = vmatmul.mubr.bf16.vlgmr.msra.gmra.mrb[4].mxu1 %v271_v51  ;;  %p1268_p6 = pnand %p1267_p5, %p1261_p2 }
 0x1fd   :  { %1088 = vmatpush3.bf16.msra.mxu0 %v1186_v50  ;;  %1103 = vmatprep.mubr.msk.bf16.mxu0 %vm1293_vm0, %v1292_v0 }
 0x1fe   :  { %1089 = vmatprep.subr.bf16.mxu0 %v1292_v0  ;;  %1123 = vmatprep.mubr.msk.bf16.mxu1 %vm1293_vm0, %v1292_v0 }
 0x1ff   :  { %1108 = vmatpush3.bf16.msra.mxu1 %v1194_v59 }
 0x200   :  { %1109 = vmatprep.subr.bf16.mxu1 %v1292_v0 }
 0x201   :  { %1090 = vmatpush3.bf16.msra.mxu0 %v1187_v52 }
 0x202   :  { %1091 = vmatprep.subr.bf16.mxu0 %v1292_v0 }
 0x203   :  { %1110 = vmatpush3.bf16.msra.mxu1 %v1195_v60 }
 0x204   :  { %1111 = vmatprep.subr.bf16.mxu1 %v1292_v0 }
 0x205   :  { %1092 = vmatpush3.bf16.msra.mxu0 %v1188_v53 }
 0x206   :  { %1093 = vmatprep.subr.bf16.mxu0 %v1292_v0 }
 0x207   :  { %1112 = vmatpush3.bf16.msra.mxu1 %v1196_v61 }
 0x208   :  { %1113 = vmatprep.subr.bf16.mxu1 %v1292_v0 }
 0x209   :  { %1094 = vmatpush3.bf16.msra.mxu0 %v1189_v54  ;;  %v853_v54 = vlaneseq }
 0x20a   :  { %1095 = vmatprep.subr.bf16.mxu0 %v1292_v0 }
 0x20b   :  { %1114 = vmatpush3.bf16.msra.mxu1 %v1197_v62 }
 0x20c   :  { %1115 = vmatprep.subr.bf16.mxu1 %v1292_v0 }
 0x20d   :  { %1096 = vmatpush3.bf16.msra.mxu0 %v1190_v55  ;;  %v854_v55 = vand.u32 127, %v853_v54 }
 0x20e   :  { %1097 = vmatprep.subr.bf16.mxu0 %v1292_v0 }
 0x20f   :  { %1116 = vmatpush3.bf16.msra.mxu1 %v1198_v63  ;;  %vm855_vm1 = vcmp.lt.s32.totalorder %v854_v55, 64 }
 0x210   :  { %1117 = vmatprep.subr.bf16.mxu1 %v1292_v0 }
 0x211   :  { %1098 = vmatpush3.bf16.msra.mxu0 %v1191_v56 }
 0x212   :  { %1099 = vmatprep.subr.bf16.mxu0 %v1292_v0 }
 0x213   :  { %1118 = vmatpush3.bf16.msra.mxu1 %v1199_v1 }
 0x214   :  { %1119 = vmatprep.subr.bf16.mxu1 %v1292_v0 }
 0x215   :  { %1100 = vmatpush3.bf16.msra.mxu0 %v1192_v57 }
 0x216   :  { %1101 = vmatprep.subr.bf16.mxu0 %v1292_v0 }
 0x217   :  { %1120 = vmatpush3.bf16.msra.mxu1 %v1200_v21 }
 0x218   :  { %1121 = vmatprep.subr.bf16.mxu1 %v1292_v0 }
 0x219   :  { %1102 = vmatpush3.bf16.msra.mxu0 %v1193_v58 }
 0x21a   :  { %1127 = vmatprep.subr.bf16.mxu0 %v1292_v0 }
 0x21b   :  { %1122 = vmatpush3.bf16.msra.mxu1 %v1201_v22 }
 0x2cf   :  { %v379_v3 = vpop.f32.mrb[4].mxu0  ;;  %v492_v4 = vpop.f32.mrb[4].mxu1 }
 0x2d0   :  { %v493_v5 = vadd.f32 %v904_v2, %v492_v4  ;;  %v1065_v6 = vpop.f32.mrb[5].mxu0  ;;  %v1085_v7 = vpop.f32.mrb[5].mxu1  ;;  %v1422_v17 = vadd.f32 %v894_v15, %v379_v3 }
 0x2d1   :  { %v382_v8 = vpop.f32.mrb[6].mxu0  ;;  %v495_v9 = vpop.f32.mrb[6].mxu1 }
 0x2d2   :  { %v498_v10 = vmul.f32 0.5, %v493_v5  ;;  %v1066_v11 = vpop.f32.mrb[7].mxu0  ;;  %v1086_v12 = vpop.f32.mrb[7].mxu1 }
 0x2d4   :  { %v499_v13 = vmul.f32 1.442695, %v498_v10 }
 0x2d6   :  { %1210 = vpow2.f32 %v499_v13 }
 0x2e0   :  { %v1211_v16 = vpop.eup %1210 }
 0x2e1   :  { %v501_v18 = vmul.f32 %v1211_v16, %v1361_v14  ;;  %v1204_v14 = vld [vmem:[#allocation5 + $0x190] sm:$0xff]  }
 0x2e3   :  { %v502_v19 = vadd.f32 %v501_v18, %v1422_v17 }
 0x2e5   :  { %v503_v20 = vpack.c.bf16 %v502_v19, %v502_v19 }
 0x2e7   :  { %1104 = vmatmul.mubr.bf16.vlgmr.msra.gmra.mrb[8].mxu0 %v503_v20 }
 0x2e8   :  { %1143 = vmatprep.mubr.msk.bf16.mxu0 %vm1293_vm0, %v1292_v0  ;;  %1128 = vmatpush3.bf16.msra.mxu0 %v1202_v23 }
 0x2e9   :  { %1129 = vmatprep.subr.bf16.mxu0 %v1292_v0 }
 0x2ec   :  { %1130 = vmatpush3.bf16.msra.mxu0 %v1203_v24 }
 0x2ed   :  { %1131 = vmatprep.subr.bf16.mxu0 %v1292_v0 }
 0x2f0   :  { %1132 = vmatpush3.bf16.msra.mxu0 %v1204_v14 }
 0x2f1   :  { %1133 = vmatprep.subr.bf16.mxu0 %v1292_v0 }
 0x2f4   :  { %1134 = vmatpush3.bf16.msra.mxu0 %v1205_v25 }
 0x2f5   :  { %1135 = vmatprep.subr.bf16.mxu0 %v1292_v0 }
 0x2f8   :  { %1136 = vmatpush3.bf16.msra.mxu0 %v1206_v26 }
 0x2f9   :  { %1137 = vmatprep.subr.bf16.mxu0 %v1292_v0 }
 0x2fc   :  { %1138 = vmatpush3.bf16.msra.mxu0 %v1207_v27 }
 0x2fd   :  { %1139 = vmatprep.subr.bf16.mxu0 %v1292_v0 }
 0x300   :  { %1140 = vmatpush3.bf16.msra.mxu0 %v1208_v36 }
 0x301   :  { %1141 = vmatprep.subr.bf16.mxu0 %v1292_v0 }
 0x304   :  { %1142 = vmatpush3.bf16.msra.mxu0 %v1209_v37 }
 0x3ba   :  { %v611_v29 = vpop.f32.mrb[8].mxu0 }
 0x3bb   :  { %v612_v30 = vadd.f32 %v914_v28, %v611_v29  ;;  %v1105_v31 = vpop.f32.mrb[9].mxu0 }
 0x3bc   :  { %v614_v32 = vpop.f32.mrb[10].mxu0 }
 0x3bd   :  { %v617_v33 = vmax.f32 %v612_v30, 0.0  ;;  %v1106_v34 = vpop.f32.mrb[11].mxu0 }
 0x3bf   :  { %v618_v35 = vpack.c.bf16 %v617_v33, %v617_v33 }
 0x3c1   :  { %1124 = vmatmul.mubr.bf16.vlgmr.msra.gmra.mrb[8].mxu1 %v618_v35 }
 0x494   :  { %v726_v39 = vpop.f32.mrb[8].mxu1 }
 0x495   :  { %v727_v40 = vadd.f32 %v924_v38, %v726_v39  ;;  %v1125_v41 = vpop.f32.mrb[9].mxu1 }
 0x496   :  { %v729_v42 = vpop.f32.mrb[10].mxu1 }
 0x497   :  { %v732_v43 = vmax.f32 %v727_v40, 0.0  ;;  %v1126_v44 = vpop.f32.mrb[11].mxu1 }
 0x499   :  { %v733_v45 = vpack.c.bf16 %v732_v43, %v732_v43 }
 0x49b   :  { %1144 = vmatmul.mubr.bf16.vlgmr.msra.gmra.mrb[12].mxu0 %v733_v45 }
 0x56e   :  { %v841_v47 = vpop.f32.mrb[12].mxu0 }
 0x56f   :  { %v842_v0 = vadd.f32 %v934_v46, %v841_v47  ;;  %v1145_v48 = vpop.f32.mrb[13].mxu0 }
 0x570   :  { %v844_v49 = vpop.f32.mrb[14].mxu0 }
 0x571   :  { %v943_v50 = vmul.f32 -1.442695, %v842_v0  ;;  %v1146_v51 = vpop.f32.mrb[15].mxu0 }
 0x573   :  { %1212 = vpow2.f32 %v943_v50 }
 0x57d   :  { %v1213_v52 = vpop.eup %1212 }
 0x57e   :  { %v850_v53 = vadd.f32 1.0, %v1213_v52 }
 0x580   :  { %1214 = vrcp.f32 %v850_v53 }
 0x58a   :  { %v1215_v56 = vpop.eup %1214 }
 0x58b   :  { %v856_v57 = vsel %vm855_vm1, %v1215_v56, %v1422_v17 }
 0x58c   :  { %857 = vst [vmem:[#allocation7] sm:$0xff] %v856_v57 }
 0x58d   :  { %1271 = shalt.err (!%p1268_p6)
}
 0x58e   :  { %s1272_s27 = scalar_lea.hbm %s1461_s3, 128 }
 0x58f   :  { %p1273_p7 = scmp.ne.s32.totalorder %s1461_s3, %s1272_s27  ;;  %p1276_p8 = scmp.lt.u32.totalorder %s1272_s27, %s1461_s3 }
 0x591   :  { %p1278_p9 = pnand %p1276_p8, %p1273_p7 }
 0x593   :  { %1281 = shalt.err (!%p1278_p9)
}
 0x594   :  { %867 = dma.vmem_to_hbm [thread:$0]  %s865_s24, 128, %s1461_s3, [#allocation4]  }
 0x595   :  { %1286 = dma.done.wait [#allocation4], 128  }
 0x596   :  { %1287 = vsyncadd [#allocation4], 4294967168 }
 0x597   :  { %871 = vsyncpa [#allocation3], 1 }
 0x598   :  { %872 = vsyncpa [#allocation6], 1 }
 0x599   :  { %873 = vsyncpa [#allocation4], 1 }

</bundles_post_ra>
